<compile_context>
chip_gen: v5e
topology: v5e:2x2
jax: 0.10.0
libtpu: 0.0.40
codegen_flags: <defaults>
</compile_context>

<pallas_src>
import jax
import jax.numpy as jnp
import numpy as np
from jax.experimental import pallas as pl
from jax.experimental.pallas import tpu as pltpu


def _aux_kernel(x_ref, wf_ref, bf_ref, o_ref):
    # x_ref : (TN, C) block of rows
    # wf_ref: (C, C)  fused weight  (W1 @ W2)
    # bf_ref: (1, C)  fused bias    (b1 @ W2 + b2)
    y = jnp.dot(x_ref[...], wf_ref[...],
                preferred_element_type=jnp.float32) + bf_ref[...]
    y = y * jax.nn.sigmoid(y)                    # SiLU
    # fft -> ifft -> real -> [:L] is the identity on the (real) MLP output,
    # so the module's output is exactly 2 * y for every row.
    o_ref[...] = (2.0 * y).astype(o_ref.dtype)


def auxiliary_branch(x, w1, b1, w2, b2, *, row_block=256):
    """x: (B, L, C) float32, W1: (C, H), b1: (1, H), W2: (H, C), b2: (1, C).

    Returns (B, L, C) float32, matching AuxiliaryBranch.forward.
    """
    B, L, C = x.shape

    # Fuse the two Linear layers (no nonlinearity between them).
    wf = jnp.dot(w1, w2)                          # (C, C)
    bf = (jnp.dot(b1, w2) + b2).reshape(1, C)     # (1, C)

    # Flatten batch/sequence into rows; the op is purely per-row.
    n = B * L
    x2 = x.reshape(n, C)

    # Row tile: multiple of 8 sublanes, capped at row_block; pad rows to a
    # whole number of tiles (padded rows are discarded after the call).
    tn = min(row_block, max(8, ((n + 7) // 8) * 8))
    n_pad = ((n + tn - 1) // tn) * tn
    if n_pad != n:
        x2 = jnp.pad(x2, ((0, n_pad - n), (0, 0)))

    grid_spec = pltpu.PrefetchScalarGridSpec(
        num_scalar_prefetch=0,
        grid=(n_pad // tn,),
        in_specs=[
            pl.BlockSpec((tn, C), lambda i: (i, 0)),   # x rows
            pl.BlockSpec((C, C), lambda i: (0, 0)),    # fused weight
            pl.BlockSpec((1, C), lambda i: (0, 0)),    # fused bias
        ],
        out_specs=pl.BlockSpec((tn, C), lambda i: (i, 0)),
    )

    out2 = pl.pallas_call(
        _aux_kernel,
        out_shape=jax.ShapeDtypeStruct((n_pad, C), jnp.float32),
        grid_spec=grid_spec,
        compiler_params=pltpu.CompilerParams(
            dimension_semantics=("parallel",)),
    )(x2, wf, bf)

    return out2[:n].reshape(B, L, C)


def _reference(x, w1, b1, w2, b2):
    # Pure-JAX reference mirroring the PyTorch module literally
    # (two Linears, SiLU, FFT/IFFT round-trip on the padded sequence axis).
    y = x @ w1 + b1[0]
    y = y @ w2 + b2[0]
    y = y * jax.nn.sigmoid(y)
    B, L, C = y.shape
    P = 1
    while P < L:
        P *= 2
    yp = jnp.pad(y, ((0, 0), (0, P - L), (0, 0)))
    ifft = jnp.fft.ifft(jnp.fft.fft(yp, axis=1), axis=1).real[:, :L, :]
    return ifft + y


if __name__ == "__main__":
    B, L, C = 2, 6, 32          # dims = 32 -> hidden = dims // 16 = 2
    H = C // 16

    key = jax.random.PRNGKey(0)
    kx, k1, k2, k3, k4 = jax.random.split(key, 5)

    x = jax.random.normal(kx, (B, L, C), dtype=jnp.float32)
    w1 = jax.random.normal(k1, (C, H), dtype=jnp.float32) * (1.0 / np.sqrt(C))
    b1 = jax.random.normal(k2, (1, H), dtype=jnp.float32) * 0.1
    w2 = jax.random.normal(k3, (H, C), dtype=jnp.float32) * (1.0 / np.sqrt(H))
    b2 = jax.random.normal(k4, (1, C), dtype=jnp.float32) * 0.1

    out = auxiliary_branch(x, w1, b1, w2, b2)
    out = jax.block_until_ready(out)

    ref = _reference(x, w1, b1, w2, b2)
    np.testing.assert_allclose(np.asarray(out), np.asarray(ref),
                               rtol=1e-4, atol=1e-4)
    print("KERNEL_OK")
</pallas_src>

<mosaic_0001>
module attributes {stable_mosaic.version = 11 : i64} {
  func.func @_aux_kernel(%arg0: i32, %arg1: memref<16x32xf32, #tpu.memory_space<vmem>>, %arg2: memref<32x32xf32, #tpu.memory_space<vmem>>, %arg3: memref<1x32xf32, #tpu.memory_space<vmem>>, %arg4: memref<16x32xf32, #tpu.memory_space<vmem>>) attributes {dimension_semantics = [#tpu.dimension_semantics<parallel>], iteration_bounds = array<i64: 1>, scalar_prefetch = 0 : i64, scratch_operands = 0 : i64, tpu.core_type = #tpu.core_type<tc>, window_params = [{transform_indices = @transform_0, window_bounds = array<i64: 16, 32>}, {pipeline_mode = #tpu.pipeline_mode<synchronous>, transform_indices = @transform_1, window_bounds = array<i64: 32, 32>}, {pipeline_mode = #tpu.pipeline_mode<synchronous>, transform_indices = @transform_2, window_bounds = array<i64: 1, 32>}, {transform_indices = @transform_3, window_bounds = array<i64: 16, 32>}]} {
    %c0 = arith.constant 0 : index
    %c0_0 = arith.constant 0 : index
    %0 = vector.load %arg1[%c0, %c0_0] : memref<16x32xf32, #tpu.memory_space<vmem>>, vector<16x32xf32>
    %c0_1 = arith.constant 0 : index
    %c0_2 = arith.constant 0 : index
    %1 = vector.load %arg2[%c0_1, %c0_2] : memref<32x32xf32, #tpu.memory_space<vmem>>, vector<32x32xf32>
    %cst = arith.constant dense<0.000000e+00> : vector<16x32xf32>
    %2 = tpu.matmul %0, %1, %cst {dimension_numbers = #tpu.dot_dimension_numbers<[1], [0], [0], [1], [0, 0, 1, 1], [], []>} : vector<16x32xf32>, vector<32x32xf32>, vector<16x32xf32> -> vector<16x32xf32>
    %c0_3 = arith.constant 0 : index
    %c0_4 = arith.constant 0 : index
    %3 = vector.load %arg3[%c0_3, %c0_4] : memref<1x32xf32, #tpu.memory_space<vmem>>, vector<1x32xf32>
    %4 = vector.broadcast %3 : vector<1x32xf32> to vector<16x32xf32>
    %5 = arith.addf %2, %4 : vector<16x32xf32>
    %6 = arith.negf %5 : vector<16x32xf32>
    %7 = math.exp %6 : vector<16x32xf32>
    %cst_5 = arith.constant 1.000000e+00 : f32
    %8 = vector.broadcast %cst_5 : f32 to vector<16x32xf32>
    %9 = arith.addf %8, %7 : vector<16x32xf32>
    %10 = arith.divf %8, %9 : vector<16x32xf32>
    %11 = arith.mulf %5, %10 : vector<16x32xf32>
    %cst_6 = arith.constant 2.000000e+00 : f32
    %12 = vector.broadcast %cst_6 : f32 to vector<16x32xf32>
    %13 = arith.mulf %12, %11 : vector<16x32xf32>
    %c0_7 = arith.constant 0 : index
    %c0_8 = arith.constant 0 : index
    %14 = vector.load %arg4[%c0_7, %c0_8] : memref<16x32xf32, #tpu.memory_space<vmem>>, vector<16x32xf32>
    tpu.vector_store %arg4[%c0_7, %c0_8], %13 {strides = array<i32>} : memref<16x32xf32, #tpu.memory_space<vmem>>, vector<16x32xf32>,
    return
  }
  func.func @transform_0(%arg0: i32) -> (i32, i32) {
    %c0_i32 = arith.constant 0 : i32
    %c0_i32_0 = arith.constant 0 : i32
    return %arg0, %c0_i32 : i32, i32
  }
  func.func @transform_1(%arg0: i32) -> (i32, i32) {
    %c0_i32 = arith.constant 0 : i32
    %c0_i32_0 = arith.constant 0 : i32
    %c0_i32_1 = arith.constant 0 : i32
    return %c0_i32, %c0_i32_0 : i32, i32
  }
  func.func @transform_2(%arg0: i32) -> (i32, i32) {
    %c0_i32 = arith.constant 0 : i32
    %c0_i32_0 = arith.constant 0 : i32
    %c0_i32_1 = arith.constant 0 : i32
    return %c0_i32, %c0_i32_0 : i32, i32
  }
  func.func @transform_3(%arg0: i32) -> (i32, i32) {
    %c0_i32 = arith.constant 0 : i32
    %c0_i32_0 = arith.constant 0 : i32
    return %arg0, %c0_i32 : i32, i32
  }
}

</mosaic_0001>

<bundles_post_ra>
// kernel: tpu_custom_call.1
= control target key start
LH: loop header
LB: loop body
LE: loop exit
PB: predicated region body
PF: predicated region fallthrough
CT: control target
= control target key end

     0   :  { %8 = vsyncpa [#allocation3], 0  ;;  %s301_s0 = inlined_call_operand.hbm [shape: f32[16,32], index: 0, kind: input, shape index: {}]   ;;  %s302_s1 = inlined_call_operand.hbm [shape: f32[32,32], index: 1, kind: input, shape index: {}]   ;;  %s303_s2 = inlined_call_operand.vmem [shape: f32[1,32], index: 2, kind: input, shape index: {}]   ;;  %s304_s3 = inlined_call_operand.hbm [shape: f32[16,32], index: 3, kind: output, shape index: {}]  }
   0x1   :  { %9 = vsyncpa [#allocation6], 0 }
   0x2   :  { %10 = vsyncpa [#allocation4], 0  ;;  %s15_s14 = sshll.u32 %s301_s0, 4  ;;  %s251_s15 = smov [#allocation2]   ;;  %s16_s14 = int_to_ptr.hbm [resolvable:$true] %s15_s14 }
   0x3   :  { %s17_s16 = sshll.u32 %s251_s15, 4  ;;  %s28_s19 = sshll.u32 %s302_s1, 4  ;;  %s18_s16 = int_to_ptr.vmem [resolvable:$true] %s17_s16  ;;  %s29_s19 = int_to_ptr.hbm [resolvable:$true] %s28_s19 }
   0x4   :  { %s252_s20 = smov 128   ;;  %s253_s21 = smov 8  }
   0x5   :  { %23 = dma.hbm_to_vmem [thread:$0]  %s16_s14, 256, %s18_s16, [#allocation3], %s252_s20, %s252_s20, %s253_s21  }
   0x6   :  { %s254_s22 = smov [#allocation5]  }
   0x7   :  { %s30_s23 = sshll.u32 %s254_s22, 4  ;;  %s31_s23 = int_to_ptr.vmem [resolvable:$true] %s30_s23 }
   0x8   :  { %36 = dma.hbm_to_vmem [thread:$0]  %s29_s19, 512, %s31_s23, [#allocation6], %s252_s20, %s252_s20, %s253_s21  }
   0x9   :  { %245 = dma.done.wait [#allocation3], 256  }
   0xa   :  { %246 = vsyncadd [#allocation3], 4294967040 }
   0xb   :  { %247 = dma.done.wait [#allocation6], 512  }
   0xc   :  { %248 = vsyncadd [#allocation6], 4294966784  ;;  %v52_v0 = vld [vmem:[#allocation5 + $0x18] sm:$0xff]  ;;  %v51_v1 = vld [vmem:[#allocation5 + $0x10] sm:$0xff]  ;;  %vm57_vm0 = vcmask 261120   ;;  %s137_s27 = sshll.u32 %s304_s3, 4  ;;  %s138_s27 = int_to_ptr.hbm [resolvable:$true] %s137_s27 }
   0xd   :  { %76 = vmatpush.msra.mxu0 %v52_v0  ;;  %155 = vmatpush.msra.mxu1 %v52_v0  ;;  %v50_v2 = vld [vmem:[#allocation5 + $0x8] sm:$0xff]  ;;  %v49_v3 = vld [vmem:[#allocation5] sm:$0xff]  ;;  %v47_v4 = vld [vmem:[#allocation2] sm:$0xff] }
   0xe   :  { %v48_v5 = vld [vmem:[#allocation2 + $0x8] sm:$0xff]  ;;  %v164_v6 = vld [vmem:[%s303_s2] ss:$0 sm:$0xff]  ;;  %s255_s2 = smov [#allocation7]  }
   0xf   :  { %77 = vmatpush.msra.mxu0 %v51_v1  ;;  %156 = vmatpush.msra.mxu1 %v51_v1  ;;  %s135_s24 = sshll.u32 %s255_s2, 4  ;;  %s136_s24 = int_to_ptr.vmem [resolvable:$true] %s135_s24 }
  0x11   :  { %78 = vmatpush.msra.mxu0 %v50_v2  ;;  %157 = vmatpush.msra.mxu1 %v50_v2 }
  0x13   :  { %79 = vmatpush.msra.mxu0 %v49_v3  ;;  %158 = vmatpush.msra.mxu1 %v49_v3 }
  0x14   :  { %151 = vmatmul.msk.f32.vlgmr.msra.gmra.mxu0 %vm57_vm0, %v47_v4  ;;  %152 = vmatmul.msk.f32.vlgmr.msra.gmra.mxu1 %vm57_vm0, %v48_v5 }
  0x91   :  { %v81_v7 = vpop.f32.mrf.mxu0  ;;  %v84_v8 = vpop.f32.mrf.mxu1 }
  0x92   :  { %v82_v9 = vadd.f32 %v164_v6, %v81_v7  ;;  %v85_v10 = vadd.f32 %v164_v6, %v84_v8 }
  0x94   :  { %v153_v11 = vmul.f32 -1.442695, %v82_v9  ;;  %v154_v12 = vmul.f32 -1.442695, %v85_v10 }
  0x96   :  { %165 = vpow2.f32 %v153_v11 }
  0x97   :  { %167 = vpow2.f32 %v154_v12 }
  0x9c   :  { %v166_v13 = vpop.eup %165 }
  0x9d   :  { %v168_v14 = vpop.eup %167  ;;  %v93_v15 = vadd.f32 1.0, %v166_v13 }
  0x9e   :  { %v94_v16 = vadd.f32 1.0, %v168_v14 }
  0x9f   :  { %169 = vrcp.f32 %v93_v15  ;;  %v106_v22 = vand.u32 2147483648, %v93_v15  ;;  %v104_v25 = vand.u32 2147483647, %v93_v15  ;;  %vm100_vm3 = vweird.f32 %v93_v15 }
  0xa0   :  { %171 = vrcp.f32 %v94_v16  ;;  %v121_v26 = vand.u32 2147483648, %v94_v16  ;;  %v119_v28 = vand.u32 2147483647, %v94_v16  ;;  %vm115_vm5 = vweird.f32 %v94_v16 }
  0xa1   :  { %v107_v30 = vor.u32 1.1754944e-38, %v106_v22  ;;  %vm105_vm6 = vcmp.eq.f32.partialorder %v104_v25, 8.507059e+37 }
  0xa2   :  { %v122_v33 = vor.u32 1.1754944e-38, %v121_v26  ;;  %vm120_vm8 = vcmp.eq.f32.partialorder %v119_v28, 8.507059e+37 }
  0xa5   :  { %v170_v17 = vpop.eup %169 }
  0xa6   :  { %v172_v18 = vpop.eup %171  ;;  %v96_v19 = vmul.f32 %v170_v17, %v93_v15  ;;  %vm101_vm1 = vweird.f32 %v170_v17 }
  0xa7   :  { %v111_v20 = vmul.f32 %v172_v18, %v94_v16  ;;  %vm116_vm2 = vweird.f32 %v172_v18  ;;  %vm102_vm4 = vmor %vm100_vm3, %vm101_vm1 }
  0xa8   :  { %v97_v21 = vsub.f32 1.0, %v96_v19  ;;  %vm117_vm7 = vmor %vm115_vm5, %vm116_vm2 }
  0xa9   :  { %v112_v23 = vsub.f32 1.0, %v111_v20 }
  0xaa   :  { %v98_v24 = vmul.f32 %v170_v17, %v97_v21 }
  0xab   :  { %v113_v27 = vmul.f32 %v172_v18, %v112_v23 }
  0xac   :  { %v99_v29 = vadd.f32 %v170_v17, %v98_v24 }
  0xad   :  { %v114_v31 = vadd.f32 %v172_v18, %v113_v27 }
  0xae   :  { %v103_v32 = vsel %vm102_vm4, %v170_v17, %v99_v29 }
  0xaf   :  { %v108_v34 = vsel %vm105_vm6, %v107_v30, %v103_v32  ;;  %v118_v35 = vsel %vm117_vm7, %v172_v18, %v114_v31 }
  0xb0   :  { %v125_v36 = vmul.f32 %v108_v34, %v82_v9  ;;  %v123_v37 = vsel %vm120_vm8, %v122_v33, %v118_v35 }
  0xb1   :  { %v126_v38 = vmul.f32 %v123_v37, %v85_v10 }
  0xb2   :  { %v127_v39 = vmul.f32 2.0, %v125_v36 }
  0xb3   :  { %v128_v40 = vmul.f32 2.0, %v126_v38 }
  0xb4   :  { %129 = vst.msk [vmem:[#allocation7] sm:$0xff] %vm57_vm0, %v127_v39 }
  0xb5   :  { %130 = vst.msk [vmem:[#allocation7 + $0x8] sm:$0xff] %vm57_vm0, %v128_v40 }
  0xb6   :  { %143 = dma.vmem_to_hbm [thread:$0]  %s136_s24, 256, %s138_s27, [#allocation4], %s252_s20, %s252_s20, %s253_s21  }
  0xb7   :  { %249 = dma.done.wait [#allocation4], 256  }
  0xb8   :  { %250 = vsyncadd [#allocation4], 4294967040 }
  0xb9   :  { %148 = vsyncpa [#allocation3], 1 }
  0xba   :  { %149 = vsyncpa [#allocation6], 1 }
  0xbb   :  { %150 = vsyncpa [#allocation4], 1 }

</bundles_post_ra>
